<compile_context>
chip_gen: v7x
topology: tpu7x:2x2x1
jax: 0.10.0
libtpu: 0.0.40
codegen_flags: <defaults>
</compile_context>

<pallas_src>
import functools

import jax
import jax.numpy as jnp
from jax.experimental import pallas as pl
from jax.experimental.pallas import tpu as pltpu


def _dw_pw_kernel(x_ref, wdw_ref, wpw_ref, bpw_ref, o_ref, *, K, H, W, pad):
    # x_ref  : (1, C, H*W)     one image; channels on sublanes, pixels on lanes
    # wdw_ref: (K*K, C, 1)     depthwise weights, one (C, 1) column per tap
    # wpw_ref: (Cout, C)       pointwise weights
    # bpw_ref: (Cout, 1)       folded depthwise bias: Wpw @ b_dw  (f32)
    # o_ref  : (1, Cout, H*W)  lane-dense output block
    C = x_ref.shape[1]
    HW = H * W

    x2 = x_ref[0]                                   # (C, HW), native dtype
    wdw = wdw_ref[...].astype(jnp.float32)          # hoisted out of the tap loop

    # Halo masks, computed once: flattened pixel index and its column index.
    p_idx = jax.lax.broadcasted_iota(jnp.int32, (C, HW), 1)
    w_idx = p_idx % W
    row_ok = {0: None}
    col_ok = {0: None}
    for d in range(-pad, K - pad):
        if d < 0:
            row_ok[d] = p_idx >= (-d) * W           # h + d >= 0
            col_ok[d] = w_idx >= -d                 # w + d >= 0
        elif d > 0:
            row_ok[d] = p_idx < (H - d) * W         # h + d <= H-1
            col_ok[d] = w_idx <= W - 1 - d          # w + d <= W-1

    # Depthwise KxK: per tap, lane-roll + halo mask + MAC, all lane-dense (VPU
    # MAC, XLU roll). acc stays in f32.
    acc = None
    for kh in range(K):
        for kw in range(K):
            dh, dw = kh - pad, kw - pad
            shift = dh * W + dw                      # source offset in lanes
            shifted = x2 if shift == 0 else pltpu.roll(x2, shift=(-shift) % HW, axis=1)
            tap = shifted.astype(jnp.float32)        # per-tap cast (bounded live range)
            mask = row_ok[dh]
            if col_ok[dw] is not None:
                mask = col_ok[dw] if mask is None else (mask & col_ok[dw])
            if mask is not None:
                tap = jnp.where(mask, tap, 0.0)
            term = tap * wdw[kh * K + kw]            # (C, 1) lane-broadcast weight
            acc = term if acc is None else acc + term

    # Pointwise 1x1 conv == channel matmul on the MXU; depthwise bias folded
    # into bpw. (For realistic C/Cout cast operands to bf16 here; at C=4 the
    # MXU is nowhere near the bottleneck, so keep f32 for accuracy.)
    out = jnp.dot(wpw_ref[...].astype(jnp.float32), acc,
                  preferred_element_type=jnp.float32)      # (Cout, HW)
    out = out + bpw_ref[...]                               # (Cout, 1) broadcast
    o_ref[0] = out.astype(o_ref.dtype)


def depthwise_conv_pallas(x_nchw, w_dw, b_dw, w_pw, *, kernel_size=3, padding=1):
    """Matches DepthWiseConv.forward (stride=1, dilation=1, zero padding).

    x_nchw: (N, C, H, W); w_dw: (C, 1, K, K); b_dw: (C,); w_pw: (Cout, C, 1, 1).
    Returns (N, Cout, H, W).
    """
    N, C, H, W = x_nchw.shape
    K = kernel_size
    Cout = w_pw.shape[0]
    HW = H * W
    assert K % 2 == 1 and padding == (K - 1) // 2, "expects odd 'same' kernel"

    # Free contiguous reshape: no transpose, no pad, no extra HBM round trips.
    x_flat = x_nchw.reshape(N, C, HW)

    # Parameter plumbing (tiny tensors).
    wdw_taps = jnp.transpose(w_dw.reshape(C, K * K), (1, 0)).reshape(K * K, C, 1)
    wpw_mat = w_pw[:, :, 0, 0]                                        # (Cout, C)
    bias_pw = jnp.dot(wpw_mat.astype(jnp.float32),
                      b_dw.astype(jnp.float32)).reshape(Cout, 1)      # f32 folded bias

    kernel = functools.partial(_dw_pw_kernel, K=K, H=H, W=W, pad=padding)

    out_flat = pl.pallas_call(
        kernel,
        out_shape=jax.ShapeDtypeStruct((N, Cout, HW), x_nchw.dtype),
        grid_spec=pltpu.PrefetchScalarGridSpec(
            num_scalar_prefetch=0,
            grid=(N,),
            in_specs=[
                pl.BlockSpec((1, C, HW), lambda n: (n, 0, 0)),
                pl.BlockSpec((K * K, C, 1), lambda n: (0, 0, 0)),
                pl.BlockSpec((Cout, C), lambda n: (0, 0)),
                pl.BlockSpec((Cout, 1), lambda n: (0, 0)),
            ],
            out_specs=pl.BlockSpec((1, Cout, HW), lambda n: (n, 0, 0)),
        ),
        compiler_params=pltpu.CompilerParams(
            dimension_semantics=("parallel",)),
    )(x_flat, wdw_taps, wpw_mat, bias_pw)

    # Already channel-major: only a free reshape back to NCHW is needed.
    return out_flat.reshape(N, Cout, H, W)


def _reference(x_nchw, w_dw, b_dw, w_pw):
    # Pure-JAX reference via lax conv (NCHW), used only for a correctness check.
    C = x_nchw.shape[1]
    dw = jax.lax.conv_general_dilated(
        x_nchw, w_dw, window_strides=(1, 1), padding=((1, 1), (1, 1)),
        dimension_numbers=("NCHW", "OIHW", "NCHW"), feature_group_count=C)
    dw = dw + b_dw.reshape(1, C, 1, 1)
    pw = jax.lax.conv_general_dilated(
        dw, w_pw, window_strides=(1, 1), padding="VALID",
        dimension_numbers=("NCHW", "OIHW", "NCHW"))
    return pw


if __name__ == "__main__":
    key = jax.random.PRNGKey(0)
    k1, k2, k3, k4 = jax.random.split(key, 4)

    N, C_in, C_out, H, W = 2, 4, 8, 16, 16
    K = 3

    x = jax.random.normal(k1, (N, C_in, H, W), dtype=jnp.float32)
    # Deterministic synthetic parameters (shapes match the PyTorch module).
    w_dw = jax.random.normal(k2, (C_in, 1, K, K), dtype=jnp.float32) * 0.1
    b_dw = jax.random.normal(k3, (C_in,), dtype=jnp.float32) * 0.1
    w_pw = jax.random.normal(k4, (C_out, C_in, 1, 1), dtype=jnp.float32) * 0.1

    out = depthwise_conv_pallas(x, w_dw, b_dw, w_pw)
    out = jax.block_until_ready(out)

    ref = jax.block_until_ready(_reference(x, w_dw, b_dw, w_pw))
    assert out.shape == (N, C_out, H, W)
    assert jnp.allclose(out, ref, atol=1e-4, rtol=1e-4)

    print("KERNEL_OK")
</pallas_src>

<mosaic_0001>
module attributes {stable_mosaic.version = 11 : i64} {
  func.func @_dw_pw_kernel(%arg0: i32, %arg1: memref<1x4x256xf32, #tpu.memory_space<vmem>>, %arg2: memref<9x4x1xf32, #tpu.memory_space<vmem>>, %arg3: memref<8x4xf32, #tpu.memory_space<vmem>>, %arg4: memref<8x1xf32, #tpu.memory_space<vmem>>, %arg5: memref<1x8x256xf32, #tpu.memory_space<vmem>>) attributes {dimension_semantics = [#tpu.dimension_semantics<parallel>], iteration_bounds = array<i64: 2>, scalar_prefetch = 0 : i64, scratch_operands = 0 : i64, tpu.core_type = #tpu.core_type<tc>, window_params = [{transform_indices = @transform_0, window_bounds = array<i64: 1, 4, 256>}, {pipeline_mode = #tpu.pipeline_mode<synchronous>, transform_indices = @transform_1, window_bounds = array<i64: 9, 4, 1>}, {pipeline_mode = #tpu.pipeline_mode<synchronous>, transform_indices = @transform_2, window_bounds = array<i64: 8, 4>}, {pipeline_mode = #tpu.pipeline_mode<synchronous>, transform_indices = @transform_3, window_bounds = array<i64: 8, 1>}, {transform_indices = @transform_4, window_bounds = array<i64: 1, 8, 256>}]} {
    %c0 = arith.constant 0 : index
    %c0_0 = arith.constant 0 : index
    %c0_1 = arith.constant 0 : index
    %0 = vector.load %arg1[%c0, %c0_0, %c0_1] : memref<1x4x256xf32, #tpu.memory_space<vmem>>, vector<1x4x256xf32>
    %1 = vector.shape_cast %0 : vector<1x4x256xf32> to vector<4x256xf32>
    %c0_2 = arith.constant 0 : index
    %c0_3 = arith.constant 0 : index
    %c0_4 = arith.constant 0 : index
    %2 = vector.load %arg2[%c0_2, %c0_3, %c0_4] : memref<9x4x1xf32, #tpu.memory_space<vmem>>, vector<9x4x1xf32>
    %3 = tpu.iota {dimensions = array<i32: 1>} : vector<4x256xi32>
    %c16_i32 = arith.constant 16 : i32
    %c0_i32 = arith.constant 0 : i32
    %4 = arith.cmpi eq, %c16_i32, %c0_i32 : i32
    %c1_i32 = arith.constant 1 : i32
    %5 = arith.select %4, %c1_i32, %c16_i32 : i32
    %6 = vector.broadcast %5 : i32 to vector<4x256xi32>
    %7 = arith.remsi %3, %6 : vector<4x256xi32>
    %c0_i32_5 = arith.constant 0 : i32
    %8 = vector.broadcast %c0_i32_5 : i32 to vector<4x256xi32>
    %9 = arith.cmpi ne, %7, %8 : vector<4x256xi32>
    %c0_i32_6 = arith.constant 0 : i32
    %10 = vector.broadcast %c0_i32_6 : i32 to vector<4x256xi32>
    %11 = arith.cmpi slt, %7, %10 : vector<4x256xi32>
    %c0_i32_7 = arith.constant 0 : i32
    %12 = arith.cmpi slt, %5, %c0_i32_7 : i32
    %13 = vector.broadcast %12 : i1 to vector<4x256xi1>
    %14 = vector.broadcast %13 : vector<4x256xi1> to vector<4x256xi1>
    %15 = arith.xori %11, %14 : vector<4x256xi1>
    %16 = arith.andi %15, %9 : vector<4x256xi1>
    %17 = vector.broadcast %5 : i32 to vector<4x256xi32>
    %18 = arith.addi %7, %17 : vector<4x256xi32>
    %19 = arith.select %16, %18, %7 : vector<4x256xi1>, vector<4x256xi32>
    %c16_i32_8 = arith.constant 16 : i32
    %20 = vector.broadcast %c16_i32_8 : i32 to vector<4x256xi32>
    %21 = arith.cmpi sge, %3, %20 : vector<4x256xi32>
    %c1_i32_9 = arith.constant 1 : i32
    %22 = vector.broadcast %c1_i32_9 : i32 to vector<4x256xi32>
    %23 = arith.cmpi sge, %19, %22 : vector<4x256xi32>
    %c240_i32 = arith.constant 240 : i32
    %24 = vector.broadcast %c240_i32 : i32 to vector<4x256xi32>
    %25 = arith.cmpi slt, %3, %24 : vector<4x256xi32>
    %c14_i32 = arith.constant 14 : i32
    %26 = vector.broadcast %c14_i32 : i32 to vector<4x256xi32>
    %27 = arith.cmpi sle, %19, %26 : vector<4x256xi32>
    %c17_i32 = arith.constant 17 : i32
    %28 = tpu.dynamic_rotate %1 by %c17_i32 dim 1 : vector<4x256xf32>, i32 -> vector<4x256xf32>
    %29 = arith.andi %21, %23 : vector<4x256xi1>
    %cst = arith.constant 0.000000e+00 : f32
    %30 = vector.broadcast %cst : f32 to vector<4x256xf32>
    %31 = arith.select %29, %28, %30 : vector<4x256xi1>, vector<4x256xf32>
    %32 = vector.extract_strided_slice %2 {offsets = [0, 0, 0], sizes = [1, 4, 1], strides = [1, 1, 1]} : vector<9x4x1xf32> to vector<1x4x1xf32>
    %33 = vector.shape_cast %32 : vector<1x4x1xf32> to vector<4x1xf32>
    %34 = vector.broadcast %33 : vector<4x1xf32> to vector<4x256xf32>
    %35 = arith.mulf %31, %34 : vector<4x256xf32>
    %c16_i32_10 = arith.constant 16 : i32
    %36 = tpu.dynamic_rotate %1 by %c16_i32_10 dim 1 : vector<4x256xf32>, i32 -> vector<4x256xf32>
    %cst_11 = arith.constant 0.000000e+00 : f32
    %37 = vector.broadcast %cst_11 : f32 to vector<4x256xf32>
    %38 = arith.select %21, %36, %37 : vector<4x256xi1>, vector<4x256xf32>
    %39 = vector.extract_strided_slice %2 {offsets = [1, 0, 0], sizes = [1, 4, 1], strides = [1, 1, 1]} : vector<9x4x1xf32> to vector<1x4x1xf32>
    %40 = vector.shape_cast %39 : vector<1x4x1xf32> to vector<4x1xf32>
    %41 = vector.broadcast %40 : vector<4x1xf32> to vector<4x256xf32>
    %42 = arith.mulf %38, %41 : vector<4x256xf32>
    %43 = arith.addf %35, %42 : vector<4x256xf32>
    %c15_i32 = arith.constant 15 : i32
    %44 = tpu.dynamic_rotate %1 by %c15_i32 dim 1 : vector<4x256xf32>, i32 -> vector<4x256xf32>
    %45 = arith.andi %21, %27 : vector<4x256xi1>
    %cst_12 = arith.constant 0.000000e+00 : f32
    %46 = vector.broadcast %cst_12 : f32 to vector<4x256xf32>
    %47 = arith.select %45, %44, %46 : vector<4x256xi1>, vector<4x256xf32>
    %48 = vector.extract_strided_slice %2 {offsets = [2, 0, 0], sizes = [1, 4, 1], strides = [1, 1, 1]} : vector<9x4x1xf32> to vector<1x4x1xf32>
    %49 = vector.shape_cast %48 : vector<1x4x1xf32> to vector<4x1xf32>
    %50 = vector.broadcast %49 : vector<4x1xf32> to vector<4x256xf32>
    %51 = arith.mulf %47, %50 : vector<4x256xf32>
    %52 = arith.addf %43, %51 : vector<4x256xf32>
    %c1_i32_13 = arith.constant 1 : i32
    %53 = tpu.dynamic_rotate %1 by %c1_i32_13 dim 1 : vector<4x256xf32>, i32 -> vector<4x256xf32>
    %cst_14 = arith.constant 0.000000e+00 : f32
    %54 = vector.broadcast %cst_14 : f32 to vector<4x256xf32>
    %55 = arith.select %23, %53, %54 : vector<4x256xi1>, vector<4x256xf32>
    %56 = vector.extract_strided_slice %2 {offsets = [3, 0, 0], sizes = [1, 4, 1], strides = [1, 1, 1]} : vector<9x4x1xf32> to vector<1x4x1xf32>
    %57 = vector.shape_cast %56 : vector<1x4x1xf32> to vector<4x1xf32>
    %58 = vector.broadcast %57 : vector<4x1xf32> to vector<4x256xf32>
    %59 = arith.mulf %55, %58 : vector<4x256xf32>
    %60 = arith.addf %52, %59 : vector<4x256xf32>
    %61 = vector.extract_strided_slice %2 {offsets = [4, 0, 0], sizes = [1, 4, 1], strides = [1, 1, 1]} : vector<9x4x1xf32> to vector<1x4x1xf32>
    %62 = vector.shape_cast %61 : vector<1x4x1xf32> to vector<4x1xf32>
    %63 = vector.broadcast %62 : vector<4x1xf32> to vector<4x256xf32>
    %64 = arith.mulf %1, %63 : vector<4x256xf32>
    %65 = arith.addf %60, %64 : vector<4x256xf32>
    %c255_i32 = arith.constant 255 : i32
    %66 = tpu.dynamic_rotate %1 by %c255_i32 dim 1 : vector<4x256xf32>, i32 -> vector<4x256xf32>
    %cst_15 = arith.constant 0.000000e+00 : f32
    %67 = vector.broadcast %cst_15 : f32 to vector<4x256xf32>
    %68 = arith.select %27, %66, %67 : vector<4x256xi1>, vector<4x256xf32>
    %69 = vector.extract_strided_slice %2 {offsets = [5, 0, 0], sizes = [1, 4, 1], strides = [1, 1, 1]} : vector<9x4x1xf32> to vector<1x4x1xf32>
    %70 = vector.shape_cast %69 : vector<1x4x1xf32> to vector<4x1xf32>
    %71 = vector.broadcast %70 : vector<4x1xf32> to vector<4x256xf32>
    %72 = arith.mulf %68, %71 : vector<4x256xf32>
    %73 = arith.addf %65, %72 : vector<4x256xf32>
    %c241_i32 = arith.constant 241 : i32
    %74 = tpu.dynamic_rotate %1 by %c241_i32 dim 1 : vector<4x256xf32>, i32 -> vector<4x256xf32>
    %75 = arith.andi %25, %23 : vector<4x256xi1>
    %cst_16 = arith.constant 0.000000e+00 : f32
    %76 = vector.broadcast %cst_16 : f32 to vector<4x256xf32>
    %77 = arith.select %75, %74, %76 : vector<4x256xi1>, vector<4x256xf32>
    %78 = vector.extract_strided_slice %2 {offsets = [6, 0, 0], sizes = [1, 4, 1], strides = [1, 1, 1]} : vector<9x4x1xf32> to vector<1x4x1xf32>
    %79 = vector.shape_cast %78 : vector<1x4x1xf32> to vector<4x1xf32>
    %80 = vector.broadcast %79 : vector<4x1xf32> to vector<4x256xf32>
    %81 = arith.mulf %77, %80 : vector<4x256xf32>
    %82 = arith.addf %73, %81 : vector<4x256xf32>
    %c240_i32_17 = arith.constant 240 : i32
    %83 = tpu.dynamic_rotate %1 by %c240_i32_17 dim 1 : vector<4x256xf32>, i32 -> vector<4x256xf32>
    %cst_18 = arith.constant 0.000000e+00 : f32
    %84 = vector.broadcast %cst_18 : f32 to vector<4x256xf32>
    %85 = arith.select %25, %83, %84 : vector<4x256xi1>, vector<4x256xf32>
    %86 = vector.extract_strided_slice %2 {offsets = [7, 0, 0], sizes = [1, 4, 1], strides = [1, 1, 1]} : vector<9x4x1xf32> to vector<1x4x1xf32>
    %87 = vector.shape_cast %86 : vector<1x4x1xf32> to vector<4x1xf32>
    %88 = vector.broadcast %87 : vector<4x1xf32> to vector<4x256xf32>
    %89 = arith.mulf %85, %88 : vector<4x256xf32>
    %90 = arith.addf %82, %89 : vector<4x256xf32>
    %c239_i32 = arith.constant 239 : i32
    %91 = tpu.dynamic_rotate %1 by %c239_i32 dim 1 : vector<4x256xf32>, i32 -> vector<4x256xf32>
    %92 = arith.andi %25, %27 : vector<4x256xi1>
    %cst_19 = arith.constant 0.000000e+00 : f32
    %93 = vector.broadcast %cst_19 : f32 to vector<4x256xf32>
    %94 = arith.select %92, %91, %93 : vector<4x256xi1>, vector<4x256xf32>
    %95 = vector.extract_strided_slice %2 {offsets = [8, 0, 0], sizes = [1, 4, 1], strides = [1, 1, 1]} : vector<9x4x1xf32> to vector<1x4x1xf32>
    %96 = vector.shape_cast %95 : vector<1x4x1xf32> to vector<4x1xf32>
    %97 = vector.broadcast %96 : vector<4x1xf32> to vector<4x256xf32>
    %98 = arith.mulf %94, %97 : vector<4x256xf32>
    %99 = arith.addf %90, %98 : vector<4x256xf32>
    %c0_20 = arith.constant 0 : index
    %c0_21 = arith.constant 0 : index
    %100 = vector.load %arg3[%c0_20, %c0_21] : memref<8x4xf32, #tpu.memory_space<vmem>>, vector<8x4xf32>
    %cst_22 = arith.constant dense<0.000000e+00> : vector<8x256xf32>
    %101 = tpu.matmul %100, %99, %cst_22 {dimension_numbers = #tpu.dot_dimension_numbers<[1], [0], [0], [1], [0, 0, 1, 1], [], []>} : vector<8x4xf32>, vector<4x256xf32>, vector<8x256xf32> -> vector<8x256xf32>
    %c0_23 = arith.constant 0 : index
    %c0_24 = arith.constant 0 : index
    %102 = vector.load %arg4[%c0_23, %c0_24] : memref<8x1xf32, #tpu.memory_space<vmem>>, vector<8x1xf32>
    %103 = vector.broadcast %102 : vector<8x1xf32> to vector<8x256xf32>
    %104 = arith.addf %101, %103 : vector<8x256xf32>
    %c0_25 = arith.constant 0 : index
    %c0_26 = arith.constant 0 : index
    %c0_27 = arith.constant 0 : index
    %105 = vector.load %arg5[%c0_25, %c0_26, %c0_27] : memref<1x8x256xf32, #tpu.memory_space<vmem>>, vector<1x8x256xf32>
    %106 = vector.shape_cast %105 : vector<1x8x256xf32> to vector<8x256xf32>
    %107 = vector.shape_cast %104 : vector<8x256xf32> to vector<1x8x256xf32>
    tpu.vector_store %arg5[%c0_25, %c0_26, %c0_27], %107 {strides = array<i32>} : memref<1x8x256xf32, #tpu.memory_space<vmem>>, vector<1x8x256xf32>,
    return
  }
  func.func @transform_0(%arg0: i32) -> (i32, i32, i32) {
    %c0_i32 = arith.constant 0 : i32
    %c0_i32_0 = arith.constant 0 : i32
    %c0_i32_1 = arith.constant 0 : i32
    return %arg0, %c0_i32, %c0_i32_0 : i32, i32, i32
  }
  func.func @transform_1(%arg0: i32) -> (i32, i32, i32) {
    %c0_i32 = arith.constant 0 : i32
    %c0_i32_0 = arith.constant 0 : i32
    %c0_i32_1 = arith.constant 0 : i32
    %c0_i32_2 = arith.constant 0 : i32
    return %c0_i32, %c0_i32_0, %c0_i32_1 : i32, i32, i32
  }
  func.func @transform_2(%arg0: i32) -> (i32, i32) {
    %c0_i32 = arith.constant 0 : i32
    %c0_i32_0 = arith.constant 0 : i32
    %c0_i32_1 = arith.constant 0 : i32
    return %c0_i32, %c0_i32_0 : i32, i32
  }
  func.func @transform_3(%arg0: i32) -> (i32, i32) {
    %c0_i32 = arith.constant 0 : i32
    %c0_i32_0 = arith.constant 0 : i32
    %c0_i32_1 = arith.constant 0 : i32
    return %c0_i32, %c0_i32_0 : i32, i32
  }
  func.func @transform_4(%arg0: i32) -> (i32, i32, i32) {
    %c0_i32 = arith.constant 0 : i32
    %c0_i32_0 = arith.constant 0 : i32
    %c0_i32_1 = arith.constant 0 : i32
    return %arg0, %c0_i32, %c0_i32_0 : i32, i32, i32
  }
}

</mosaic_0001>

<bundles_post_ra>
// kernel: tpu_custom_call.1
= control target key start
LH: loop header
LB: loop body
LE: loop exit
PB: predicated region body
PF: predicated region fallthrough
CT: control target
= control target key end

     0   :  { %9 = vsyncpa [#allocation3], 0  ;;  %s1004_s0 = inlined_call_operand.vmem [shape: f32[2,4,256], index: 0, kind: input, shape index: {}]   ;;  %s1005_s1 = inlined_call_operand.vmem [shape: f32[9,4,1], index: 1, kind: input, shape index: {}]   ;;  %s1006_s2 = inlined_call_operand.vmem [shape: f32[8,4], index: 2, kind: input, shape index: {}]   ;;  %s1007_s3 = inlined_call_operand.vmem [shape: f32[8,1], index: 3, kind: input, shape index: {}]   ;;  %s1008_s4 = inlined_call_operand.hbm [shape: f32[2,8,256], index: 4, kind: output, shape index: {}]  }
   0x1   :  { %11 = vsyncpa [#allocation3 + $0x1], 0  ;;  %s748_s15 = smov 0   ;;  %s750_s16 = smov 0  }
   0x2   :  { %s752_s17 = smov 0   ;;  %s754_s18 = smov 0  }
   0x3 LB: > { %s769_s19 = sadd.s32 4294967295, %s709_s18   ;;  %s577_s20 = sadd.s32 4294967294, %s709_s18   ;;  %s709_s18 = sphi %s754_s18, %s1028_s18   ;;  %s705_s17 = sphi %s752_s17, %s1027_s17   ;;  %s701_s16 = sphi %s750_s16, %s1026_s16   ;;  %s697_s15 = sphi %s748_s15, %s1025_s15  }
   0x4   : > { %s773_s21 = sadd.s32 1, %s709_s18   ;;  %s113_s22 = sadd.s32 1, %s705_s17 }
   0x5   : > { %s110_s23 = ssub.s32 %s709_s18, %s773_s21  ;;  %p123_p0 = scmp.ne.s32.totalorder %s705_s17, %s701_s16 }
   0x6   : > { %p111_p1 = scmp.eq.s32.totalorder %s110_s23, 0  ;;  %p124_p2 = scmp.eq.s32.totalorder %s769_s19, 1 }
   0x7   : > { %p129_p3 = scmp.ne.s32.totalorder %s701_s16, %s697_s15  ;;  %p130_p4 = scmp.eq.s32.totalorder %s577_s20, 1 }
   0x8   : > { %s784_s24 = scalar_select %p111_p1, %s705_s17, %s113_s22  }
   0x9   : > { %p786_p5 = por %p124_p2, %p123_p0  ;;  %p790_p6 = por %p130_p4, %p129_p3 }
   0xa   : > { %p580_p7 = scmp.ge.s32.totalorder %s709_s18, 1  ;;  %p165_p8 = scmp.lt.s32.totalorder %s709_s18, 3 }
   0xc   : > { %p166_p9 = pnand %p580_p7, %p165_p8 }
   0xd   : > { %v199_v0 = vld [vmem:[%s1005_s1 + $0x8] sm:$0xf] (!%p166_p9)  ;;  %v197_v1 = vld [vmem:[%s1005_s1] sm:$0xf] (!%p166_p9)  ;;  %p191_p10 = scmp.lt.s32.totalorder (!%p166_p9), %s769_s19, 1  ;;  %v711_v2 = vmov (!%p166_p9), 0   ;;  %v206_v22 = vlaneseq (!%p166_p9) }
   0xe   : > { %169 = sbr.rel (%p166_p9) target bundleno = 429 (0x1ad), region = 36  ;;  %645 = vset.pattern.permute.xlu1 (!%p166_p9), %v711_v2  ;;  %644 = vset.pattern.permute.xlu0 (!%p166_p9), %v711_v2  ;;  %v201_v3 = vld [vmem:[%s1005_s1 + $0x10] sm:$0xf] (!%p166_p9)  ;;  %v198_v4 = vld [vmem:[%s1005_s1 + $0x4] sm:$0xf] (!%p166_p9)  ;;  %s712_s22 = smov (!%p166_p9), 17  }
   0xf   : > { %293 = vperm.xlu1 (!%p166_p9), %645, %v199_v0   ;;  %257 = vperm.xlu0 (!%p166_p9), %644, %v197_v1   ;;  %v200_v5 = vld [vmem:[%s1005_s1 + $0xc] sm:$0xf] (!%p166_p9)  ;;  %s713_s23 = smov (!%p166_p9), 16   ;;  %s714_s27 = smov (!%p166_p9), 15   ;;  %v202_v8 = vld [vmem:[%s1005_s1 + $0x14] sm:$0xf] (!%p166_p9) }
  0x10   : > { %s715_s30 = smov (!%p166_p9), 1   ;;  %v204_v9 = vld [vmem:[%s1005_s1 + $0x1c] sm:$0xf] (!%p166_p9)  ;;  %v203_v10 = vld [vmem:[%s1005_s1 + $0x18] sm:$0xf] (!%p166_p9)  ;;  %s716_s9 = smov (!%p166_p9), 127  }
  0x11   : > { %v205_v11 = vld [vmem:[%s1005_s1 + $0x20] sm:$0xf] (!%p166_p9)  ;;  %s717_s12 = smov (!%p166_p9), 113   ;;  %s719_s14 = smov (!%p166_p9), 111   ;;  %v720_v13 = vmov (!%p166_p9), 0.0   ;;  %v845_v23 = vand.u32 (!%p166_p9), 127, %v206_v22 }
  0x12   : > { %v413_v12 = vld [vmem:[%s1007_s3] sm:$0xff] (!%p166_p9)  ;;  %494 = vmatprep.mubr.f32.mxu0 (!%p166_p9), %v720_v13  ;;  %v721_v30 = vmov (!%p166_p9), 839922192   ;;  %v326_v39 = vshrl.u32 (!%p166_p9), %v206_v22, 7  ;;  %s188_s28 = sand.u32 (!%p166_p9), 1, %s701_s16   ;;  %s722_s11 = smov (!%p166_p9), [#allocation2]  }
  0x13   : > { %320 = vperm.xlu1 (!%p166_p9), %645, %v201_v3   ;;  %273 = vperm.xlu0 (!%p166_p9), %644, %v198_v4   ;;  %v848_v26 = vadd.s32 (!%p166_p9), 128, %v845_v23  ;;  %v213_v27 = vand.u32 (!%p166_p9), 15, %v845_v23  ;;  %v323_v31 = vunpack.c.l.s4 (!%p166_p9), %v721_v30  ;;  %vm266_vm0 = vcmp.lt.s32.totalorder (!%p166_p9), %v845_v23, 16  ;;  %s581_s29 = sshll.u32 (!%p166_p9), %s188_s28, 4 }
  0x14   : > { %vm233_vm1 = vcmp.ge.s32.totalorder (!%p166_p9), %v845_v23, 16  ;;  %vm248_vm3 = vcmp.lt.s32.totalorder (!%p166_p9), %v845_v23, 17  ;;  %vm284_vm5 = vcmp.lt.s32.totalorder (!%p166_p9), %v845_v23, 15  ;;  %vm304_vm7 = vcmp.lt.s32.totalorder (!%p166_p9), %v845_v23, 1 }
  0x15   : > { %s192_s5 = scalar_select %p191_p10, %s769_s19, 1  ;;  %v220_v32 = vand.u32 15, %v848_v26  ;;  %vm856_vm2 = vcmp.ge.s32.totalorder %v213_v27, 1  ;;  %vm861_vm4 = vcmp.le.s32.totalorder %v213_v27, 14  ;;  %v324_v38 = vunpack.c.0.s8 %v323_v31 }
  0x16   : > { %vm872_vm6 = vmand %vm233_vm1, %vm856_vm2  ;;  %vm340_vm11 = vcmp.lt.s32.totalorder %v845_v23, 127  ;;  %vm238_vm12 = vcmp.lt.s32.totalorder %v848_v26, 240  ;;  %vm358_vm13 = vcmp.lt.s32.totalorder %v845_v23, 113  ;;  %vm378_vm15 = vcmp.lt.s32.totalorder %v845_v23, 112  ;;  %v412_v26 = vld [vmem:[%s1006_s2] sm:$0xff] }
  0x17   : > { %s592_s10 = sshll.u32 %s192_s5, 3  ;;  %311 = vperm.xlu0 %644, %v200_v5   ;;  %vm877_vm8 = vcmp.ge.s32.totalorder %v220_v32, 1  ;;  %vm885_vm9 = vmand %vm233_vm1, %vm861_vm4  ;;  %vm891_vm10 = vcmp.le.s32.totalorder %v220_v32, 14  ;;  %v327_v53 = vsub.s32 %v324_v38, %v326_v39  ;;  %s190_s5 = scalar_lea.vmem [#allocation2], %s581_s29 }
  0x18   : > { %s195_s13 = scalar_lea.vmem %s1004_s0, %s592_s10  ;;  %vm930_vm14 = vmand %vm238_vm12, %vm877_vm8  ;;  %s518_s6 = sshll.u32 %s190_s5, 4  ;;  %s964_s6 = int_to_ptr.vmem [resolvable:$true] %s518_s6 }
  0x19   : > { %v816_v6 = vld [vmem:[%s195_s13] sm:$0xff]  ;;  %s718_s13 = smov 112   ;;  %s647_s10 = scalar_lea.vmem %s964_s6, 256 }
  0x1a   : > { %244 = vrot.lane.b32.xlu1 %v816_v6, %s712_s22  ;;  %v242_v7 = vcombine.high %v816_v6, %v816_v6  ;;  %p648_p11 = scmp.ne.s32.totalorder %s964_s6, %s647_s10 }
  0x1c   : > { %246 = vrot.lane.b32.xlu0 %v242_v7, %s712_s22  ;;  %p649_p12 = pnand %p648_p11, %p786_p5 }
  0x1e   : > { %262 = vrot.lane.b32.xlu1 %v816_v6, %s713_s23  ;;  %p650_p13 = pneg %p649_p12 }
  0x20   : > { %264 = vrot.lane.b32.xlu0 %v242_v7, %s713_s23 }
  0x22   : > { %280 = vrot.lane.b32.xlu1 %v816_v6, %s714_s27 }
  0x24   : > { %282 = vrot.lane.b32.xlu0 %v242_v7, %s714_s27 }
  0x26   : > { %347 = vperm.xlu1 %645, %v202_v8  }
  0x28   : > { %300 = vrot.lane.b32.xlu0 %v816_v6, %s715_s30 }
  0x2a   : > { %302 = vrot.lane.b32.xlu1 %v242_v7, %s715_s30  ;;  %s593_s30 = sshll.u32 %s769_s19, 8  ;;  %s504_s19 = scalar_lea.sflag [#allocation3], %s188_s28 }
  0x2c   : > { %367 = vperm.xlu0 %644, %v203_v10  }
  0x2e   : > { %385 = vperm.xlu1 %645, %v204_v9  }
  0x30   : > { %336 = vrot.lane.b32.xlu0 %v816_v6, %s716_s9 }
  0x32   : > { %338 = vrot.lane.b32.xlu1 %v242_v7, %s716_s9  ;;  %s962_s9 = scalar_lea.hbm %s1008_s4, %s593_s30 }
  0x34   : > { %405 = vperm.xlu0 %644, %v205_v11  }
  0x36   : > { %354 = vrot.lane.b32.xlu1 %v816_v6, %s717_s12 }
  0x38   : > { %356 = vrot.lane.b32.xlu0 %v242_v7, %s717_s12  ;;  %s651_s12 = sshll.u32 %s722_s11, 4  ;;  %s652_s12 = int_to_ptr.vmem [resolvable:$false] %s651_s12 }
  0x39   : > { %p654_p0 = scmp.lt.s32.totalorder %s964_s6, %s652_s12 }
  0x3a   : > { %374 = vrot.lane.b32.xlu1 %v816_v6, %s718_s13 }
  0x3c   : > { %376 = vrot.lane.b32.xlu0 %v242_v7, %s718_s13  ;;  %s653_s13 = scalar_lea.vmem %s652_s12, 512 }
  0x3d   : > { %p655_p1 = scmp.lt.s32.totalorder %s653_s13, %s647_s10 }
  0x3e   : > { %392 = vrot.lane.b32.xlu1 %v816_v6, %s719_s14 }
  0x3f   : > { %p656_p2 = por %p655_p1, %p654_p0 }
  0x40   : > { %394 = vrot.lane.b32.xlu0 %v242_v7, %s719_s14 }
  0x41   : > { %p657_p3 = pnand %p656_p2, %p650_p13 }
  0x42   : > { %416 = vperm.xlu1 %645, %v413_v12  }
  0x8e   : > { %v294_v14 = vpop.permute.xlu1 %293  ;;  %v258_v15 = vpop.permute.xlu0 %257 }
  0x92   : > { %v843_v16 = vpop.permute.xlu1 %320  ;;  %v274_v17 = vpop.permute.xlu0 %273 }
  0x93   : > { %v328_v3 = vrot.slane %v843_v16, %v327_v53 }
  0x96   : > { %v312_v18 = vpop.permute.xlu0 %311  ;;  %v245_v19 = vpop.permute.xlu1 %244 }
  0x9a   : > { %v263_v20 = vpop.permute.xlu1 %262  ;;  %v247_v21 = vpop.permute.xlu0 %246 }
  0x9b   : > { %v250_v42 = vsel %vm248_vm3, %v247_v21, %v245_v19  ;;  %v249_v45 = vsel %vm248_vm3, %v245_v19, %v247_v21  ;;  %vm419_vm3 = vcmask 31744  }
  0x9c   : > { %v253_v54 = vsel %vm872_vm6, %v250_v42, 0.0  ;;  %v254_v57 = vsel %vm877_vm8, %v249_v45, 0.0 }
  0x9d   : > { %v260_v0 = vmul.f32 %v258_v15, %v253_v54  ;;  %v261_v4 = vmul.f32 %v258_v15, %v254_v57 }
  0x9e   : > { %v281_v24 = vpop.permute.xlu1 %280  ;;  %v265_v25 = vpop.permute.xlu0 %264 }
  0x9f   : > { %v268_v37 = vsel %vm266_vm0, %v265_v25, %v263_v20  ;;  %v267_v51 = vsel %vm266_vm0, %v263_v20, %v265_v25  ;;  %v330_v20 = vmul.f32 %v328_v3, %v816_v6  ;;  %vm396_vm0 = vcmp.lt.s32.totalorder %v845_v23, 111 }
  0xa0   : > { %v269_v46 = vsel %vm233_vm1, %v268_v37, 0.0  ;;  %v277_v60 = vmul.f32 %v274_v17, %v267_v51  ;;  %vm400_vm1 = vmand %vm238_vm12, %vm891_vm10 }
  0xa1   : > { %v276_v58 = vmul.f32 %v274_v17, %v269_v46 }
  0xa2   : > { %v283_v29 = vpop.permute.xlu0 %282  ;;  %v279_v10 = vadd.f32 %v277_v60, %v261_v4 }
  0xa3   : > { %v286_v44 = vsel %vm284_vm5, %v283_v29, %v281_v24  ;;  %v285_v48 = vsel %vm284_vm5, %v281_v24, %v283_v29  ;;  %v278_v7 = vadd.f32 %v276_v58, %v260_v0  ;;  %v332_v29 = vcombine.high %v330_v20, %v330_v20 }
  0xa4   : > { %v289_v55 = vsel %vm885_vm9, %v286_v44, 0.0  ;;  %v290_v59 = vsel %vm891_vm10, %v285_v48, 0.0 }
  0xa5   : > { %v851_v28 = vpop.permute.xlu1 %347  ;;  %v296_v1 = vmul.f32 %v294_v14, %v289_v55  ;;  %v297_v5 = vmul.f32 %v294_v14, %v290_v59 }
  0xa6   : > { %v301_v36 = vpop.permute.xlu0 %300 }
  0xa7   : > { %v298_v17 = vadd.f32 %v296_v1, %v278_v7  ;;  %v299_v16 = vadd.f32 %v297_v5, %v279_v10 }
  0xa9   : > { %v303_v35 = vpop.permute.xlu1 %302 }
  0xaa   : > { %v306_v52 = vsel %vm304_vm7, %v303_v35, %v301_v36  ;;  %v305_v56 = vsel %vm304_vm7, %v301_v36, %v303_v35 }
  0xab   : > { %v368_v50 = vpop.permute.xlu0 %367  ;;  %v307_v61 = vsel %vm856_vm2, %v306_v52, 0.0  ;;  %v308_v2 = vsel %vm877_vm8, %v305_v56, 0.0 }
  0xac   : > { %v314_v8 = vmul.f32 %v312_v18, %v307_v61  ;;  %v315_v11 = vmul.f32 %v312_v18, %v308_v2 }
  0xad   : > { %v895_v49 = vpop.permute.xlu1 %385 }
  0xae   : > { %v316_v15 = vadd.f32 %v314_v8, %v298_v17  ;;  %v317_v21 = vadd.f32 %v315_v11, %v299_v16 }
  0xaf   : > { %v337_v63 = vpop.permute.xlu0 %336 }
  0xb0   : > { %v334_v35 = vadd.f32 %v330_v20, %v316_v15  ;;  %v335_v38 = vadd.f32 %v332_v29, %v317_v21 }
  0xb1   : > { %v339_v62 = vpop.permute.xlu1 %338 }
  0xb2   : > { %v341_v9 = vsel %vm340_vm11, %v337_v63, %v339_v62  ;;  %v342_v19 = vsel %vm340_vm11, %v339_v62, %v337_v63 }
  0xb3   : > { %v406_v13 = vpop.permute.xlu0 %405  ;;  %v343_v14 = vsel %vm861_vm4, %v341_v9, 0.0  ;;  %v344_v22 = vsel %vm891_vm10, %v342_v19, 0.0 }
  0xb4   : > { %v350_v24 = vmul.f32 %v851_v28, %v343_v14  ;;  %v351_v36 = vmul.f32 %v851_v28, %v344_v22 }
  0xb5   : > { %v355_v12 = vpop.permute.xlu1 %354 }
  0xb6   : > { %v352_v40 = vadd.f32 %v350_v24, %v334_v35  ;;  %v353_v33 = vadd.f32 %v351_v36, %v335_v38 }
  0xb7   : > { %v357_v6 = vpop.permute.xlu0 %356 }
  0xb8   : > { %v359_v25 = vsel %vm358_vm13, %v355_v12, %v357_v6  ;;  %v360_v27 = vsel %vm358_vm13, %v357_v6, %v355_v12 }
  0xb9   : > { %v375_v30 = vpop.permute.xlu1 %374  ;;  %v363_v31 = vsel %vm856_vm2, %v359_v25, 0.0  ;;  %v364_v32 = vsel %vm930_vm14, %v360_v27, 0.0  ;;  %vm423_vm2 = vcmask 1043456  }
  0xba   : > { %v370_v37 = vmul.f32 %v368_v50, %v363_v31  ;;  %v371_v41 = vmul.f32 %v368_v50, %v364_v32 }
  0xbb   : > { %v377_v39 = vpop.permute.xlu0 %376 }
  0xbc   : > { %v379_v42 = vsel %vm378_vm15, %v375_v30, %v377_v39  ;;  %v380_v43 = vsel %vm378_vm15, %v377_v39, %v375_v30  ;;  %v372_v45 = vadd.f32 %v370_v37, %v352_v40  ;;  %v373_v53 = vadd.f32 %v371_v41, %v353_v33 }
  0xbd   : > { %v382_v44 = vsel %vm238_vm12, %v380_v43, 0.0  ;;  %v388_v46 = vmul.f32 %v895_v49, %v379_v42  ;;  %v393_v28 = vpop.permute.xlu1 %392 }
  0xbe   : > { %v389_v48 = vmul.f32 %v895_v49, %v382_v44 }
  0xbf   : > { %v395_v50 = vpop.permute.xlu0 %394  ;;  %v390_v55 = vadd.f32 %v388_v46, %v372_v45 }
  0xc0   : > { %v397_v51 = vsel %vm396_vm0, %v393_v28, %v395_v50  ;;  %v398_v52 = vsel %vm396_vm0, %v395_v50, %v393_v28  ;;  %v391_v57 = vadd.f32 %v389_v48, %v373_v53 }
  0xc1   : > { %v401_v23 = vsel %vm861_vm4, %v397_v51, 0.0  ;;  %v402_v54 = vsel %vm400_vm1, %v398_v52, 0.0  ;;  %v417_v34 = vpop.permute.xlu1 %416 }
  0xc2   : > { %v408_v56 = vmul.f32 %v406_v13, %v401_v23  ;;  %v409_v49 = vmul.f32 %v406_v13, %v402_v54 }
  0xc4   : > { %v411_v47 = vadd.f32 %v409_v49, %v391_v57  ;;  %v410_v58 = vadd.f32 %v408_v56, %v390_v55 }
  0xc6   : > { %584 = vmatprep.subr.msk.mxu0 %vm423_vm2, %v411_v47 }
  0xc7   : > { %585 = vmatpush1.msk.msra.mxu0 %vm423_vm2, %v410_v58 }
  0xc8   : > { %586 = vmatmul.mubr.msk.f32.vlgmr.msra.gmra.mrb[0].mxu0 %vm419_vm3, %v412_v26 }
 0x19b   : > { %v496_v59 = vpop.f32.mrb[0].mxu0 }
 0x19c   : > { %v497_v60 = vadd.f32 %v496_v59, %v417_v34  ;;  %v498_v61 = vpop.f32.mrb[1].mxu0 }
 0x19d   : > { %v499_v62 = vadd.f32 %v498_v61, %v417_v34 }
 0x19e   : > { %501 = vst [vmem:[%s190_s5] sm:$0xff] %v497_v60 }
 0x19f   : > { %502 = vst [vmem:[%s190_s5 + $0x8] sm:$0xff] %v499_v62 }
 0x1a0   : > { %660 = shalt.err (!%p657_p3)
}
 0x1a1   : > { %s661_s14 = scalar_lea.hbm %s962_s9, 256  ;;  %s665_s23 = scalar_lea.hbm %s1008_s4, 512 }
 0x1a2   : > { %p662_p4 = scmp.ne.s32.totalorder %s962_s9, %s661_s14  ;;  %p666_p9 = scmp.lt.u32.totalorder %s962_s9, %s1008_s4 }
 0x1a3   : > { %p667_p10 = scmp.lt.u32.totalorder %s665_s23, %s661_s14  ;;  %p669_p12 = scmp.lt.u32.totalorder %s661_s14, %s962_s9 }
 0x1a4   : > { %p663_p7 = pnand %p662_p4, %p786_p5 }
 0x1a5   : > { %p668_p11 = por %p667_p10, %p666_p9 }
 0x1a6   : > { %p664_p8 = pneg %p663_p7 }
 0x1a7   : > { %p670_p13 = por %p669_p12, %p668_p11 }
 0x1a9   : > { %p671_p0 = pnand %p670_p13, %p664_p8 }
 0x1ab   : > { %674 = shalt.err (!%p671_p0)
}
 0x1ac   : > { %594 = dma.vmem_to_hbm [thread:$0]  (%p786_p5), %s964_s6, 256, %s962_s9, %s504_s19  }
 0x1ad PF: > { %p600_p1 = scmp.ge.s32.totalorder %s709_s18, 2  ;;  %s530_s29 = sand.u32 1, %s697_s15  }
 0x1ae   : > { %s531_s30 = scalar_lea.sflag [#allocation3], %s530_s29 }
 0x1af   : > { %p597_p2 = pnand %p600_p1, %p790_p6 }
 0x1b1   : > { %692 = dma.done.wait (!%p597_p2), %s531_s30, 256  }
 0x1b2   : > { %694 = vsyncadd (!%p597_p2), %s531_s30, 4294967040  ;;  %p14_p3 = scmp.ge.s32.totalorder %s773_s21, 4   ;;  %s1025_s15 = smov %s701_s16 }
 0x1b3   : > { %s1026_s16 = smov %s705_s17  ;;  %s1027_s17 = smov %s784_s24 }
 0x1b4   : > { %s1028_s18 = smov %s773_s21  ;;  %16 = sbr.rel (!%p14_p3) target bundleno = 3 (0x3), region = 71 }
 0x1bb   :  { %536 = vsyncpa [#allocation3], 1 }
 0x1bc   :  { %538 = vsyncpa [#allocation3 + $0x1], 1 }

</bundles_post_ra>
